<compile_context>
chip_gen: v7x
topology: tpu7x:2x2x1
jax: 0.10.0
libtpu: 0.0.40
codegen_flags: <defaults>
</compile_context>

<pallas_src>
import jax
import jax.numpy as jnp
from jax.experimental import pallas as pl
from jax.experimental.pallas import tpu as pltpu

MIN_VALUE = -1.0
MAX_VALUE = 1.0
_SCALE = 255.0 / (MAX_VALUE - MIN_VALUE)


def _post_synth_kernel(x_ref, o_ref):
    x = x_ref[...].astype(jnp.float32)       # upcast in-kernel (cheap VPU op)
    y = (x - MIN_VALUE) * _SCALE
    o_ref[...] = jnp.clip(y + 0.5, 0.0, 255.0)


def post_synthesis_processing(synthesized_image, *, tile_rows=512):
    """Apply post-synthesis scaling/clamping. Input: NCHW array (any float dtype).

    Returns float32 (matching the PyTorch module's promotion to float32).
    """
    orig_shape = synthesized_image.shape
    x = synthesized_image
    total = x.size

    # Pick the widest lane-dense slab width that divides the element count so
    # the common case needs no pad (which would cost a full extra HBM pass).
    width = None
    for w in (1024, 512, 256, 128):
        if total % w == 0:
            width = w
            break
    if width is None:
        width = 1024
        padded = ((total + width - 1) // width) * width
        flat = jnp.pad(x.reshape(-1), (0, padded - total))
    else:
        padded = total
        flat = x.reshape(-1)

    rows = padded // width
    slab = flat.reshape(rows, width)

    # Row tile: ~2 MiB f32 blocks for wide slabs. Block rows must be a
    # multiple of 8 OR equal the full row extent.
    tr_full = max(8, (tile_rows // 8) * 8)
    tr = tr_full if rows > tr_full else rows
    grid = (pl.cdiv(rows, tr),)  # ragged last block is masked (elementwise-safe)

    out = pl.pallas_call(
        _post_synth_kernel,
        out_shape=jax.ShapeDtypeStruct((rows, width), jnp.float32),
        grid_spec=pltpu.PrefetchScalarGridSpec(
            num_scalar_prefetch=0,
            grid=grid,
            in_specs=[pl.BlockSpec((tr, width), lambda i: (i, 0))],
            out_specs=pl.BlockSpec((tr, width), lambda i: (i, 0)),
        ),
        compiler_params=pltpu.CompilerParams(
            dimension_semantics=("parallel",),
        ),
    )(slab)

    if padded != total:
        out = out.reshape(-1)[:total]
    # Output stays float32, matching torch's type promotion in the module.
    # TODO(synk): if the downstream consumer wants uint8 pixels, emit uint8
    # directly from the kernel to cut output HBM traffic 4x.
    return out.reshape(orig_shape)


def _reference(x):
    y = (x.astype(jnp.float32) - MIN_VALUE) * _SCALE
    return jnp.clip(y + 0.5, 0.0, 255.0)


if __name__ == "__main__":
    key = jax.random.PRNGKey(0)
    # Synthesized image roughly in [-1, 1] with out-of-range values to
    # exercise the clamp. NCHW: batch=2, channels=4, H=16, W=16.
    x = jax.random.uniform(key, (2, 4, 16, 16), dtype=jnp.float32,
                           minval=-1.5, maxval=1.5)

    out = post_synthesis_processing(x)
    out = jax.block_until_ready(out)

    ref = _reference(x)
    assert out.shape == x.shape
    assert out.dtype == jnp.float32
    assert jnp.allclose(out, ref, atol=1e-5, rtol=1e-5)

    # Also exercise a bf16 input (no wrapper upcast; in-kernel cast).
    x_bf16 = x.astype(jnp.bfloat16)
    out_bf16 = jax.block_until_ready(post_synthesis_processing(x_bf16))
    assert out_bf16.dtype == jnp.float32
    assert jnp.allclose(out_bf16, _reference(x_bf16), atol=1e-2, rtol=1e-2)

    print("KERNEL_OK")
</pallas_src>

<mosaic_0001>
module attributes {stable_mosaic.version = 11 : i64} {
  func.func @_post_synth_kernel(%arg0: i32, %arg1: memref<2x1024xf32, #tpu.memory_space<vmem>>, %arg2: memref<2x1024xf32, #tpu.memory_space<vmem>>) attributes {dimension_semantics = [#tpu.dimension_semantics<parallel>], iteration_bounds = array<i64: 1>, scalar_prefetch = 0 : i64, scratch_operands = 0 : i64, tpu.core_type = #tpu.core_type<tc>, window_params = [{transform_indices = @transform_0, window_bounds = array<i64: 2, 1024>}, {transform_indices = @transform_1, window_bounds = array<i64: 2, 1024>}]} {
    %c0 = arith.constant 0 : index
    %c0_0 = arith.constant 0 : index
    %0 = vector.load %arg1[%c0, %c0_0] : memref<2x1024xf32, #tpu.memory_space<vmem>>, vector<2x1024xf32>
    %cst = arith.constant -1.000000e+00 : f32
    %1 = vector.broadcast %cst : f32 to vector<2x1024xf32>
    %2 = arith.subf %0, %1 : vector<2x1024xf32>
    %cst_1 = arith.constant 1.275000e+02 : f32
    %3 = vector.broadcast %cst_1 : f32 to vector<2x1024xf32>
    %4 = arith.mulf %2, %3 : vector<2x1024xf32>
    %cst_2 = arith.constant 5.000000e-01 : f32
    %5 = vector.broadcast %cst_2 : f32 to vector<2x1024xf32>
    %6 = arith.addf %4, %5 : vector<2x1024xf32>
    %cst_3 = arith.constant 0.000000e+00 : f32
    %cst_4 = arith.constant 2.550000e+02 : f32
    %7 = vector.broadcast %cst_3 : f32 to vector<2x1024xf32>
    %8 = arith.maximumf %7, %6 : vector<2x1024xf32>
    %9 = vector.broadcast %cst_4 : f32 to vector<2x1024xf32>
    %10 = arith.minimumf %9, %8 : vector<2x1024xf32>
    %c0_5 = arith.constant 0 : index
    %c0_6 = arith.constant 0 : index
    %11 = vector.load %arg2[%c0_5, %c0_6] : memref<2x1024xf32, #tpu.memory_space<vmem>>, vector<2x1024xf32>
    tpu.vector_store %arg2[%c0_5, %c0_6], %10 {strides = array<i32>} : memref<2x1024xf32, #tpu.memory_space<vmem>>, vector<2x1024xf32>,
    return
  }
  func.func @transform_0(%arg0: i32) -> (i32, i32) {
    %c0_i32 = arith.constant 0 : i32
    %c0_i32_0 = arith.constant 0 : i32
    return %arg0, %c0_i32 : i32, i32
  }
  func.func @transform_1(%arg0: i32) -> (i32, i32) {
    %c0_i32 = arith.constant 0 : i32
    %c0_i32_0 = arith.constant 0 : i32
    return %arg0, %c0_i32 : i32, i32
  }
}

</mosaic_0001>

<bundles_post_ra>
// kernel: tpu_custom_call.1
= control target key start
LH: loop header
LB: loop body
LE: loop exit
PB: predicated region body
PF: predicated region fallthrough
CT: control target
= control target key end

     0   :  { %6 = vsyncpa [#allocation3], 0  ;;  %s138_s0 = inlined_call_operand.hbm [shape: f32[2,1024], index: 0, kind: input, shape index: {}]   ;;  %s139_s1 = inlined_call_operand.hbm [shape: f32[2,1024], index: 1, kind: output, shape index: {}]  }
   0x1   :  { %7 = vsyncpa [#allocation4], 0  ;;  %s102_s6 = smov [#allocation2]   ;;  %s54_s10 = scalar_lea.hbm %s138_s0, 256 }
   0x2   :  { %s14_s7 = sshll.u32 %s102_s6, 4  ;;  %p55_p0 = scmp.ne.s32.totalorder %s138_s0, %s54_s10  ;;  %s15_s7 = int_to_ptr.vmem [resolvable:$true] %s14_s7 }
   0x3   :  { %p58_p1 = scmp.lt.u32.totalorder %s54_s10, %s138_s0 }
   0x5   :  { %p60_p2 = pnand %p58_p1, %p55_p0 }
   0x7   :  { %63 = shalt.err (!%p60_p2)
}
   0x8   :  { %s64_s15 = scalar_lea.vmem %s15_s7, 256  ;;  %p69_p4 = scmp.lt.s32.totalorder %s15_s7, %s15_s7 }
   0x9   :  { %p65_p3 = scmp.ne.s32.totalorder %s15_s7, %s64_s15  ;;  %p70_p5 = scmp.lt.s32.totalorder %s64_s15, %s64_s15 }
   0xb   :  { %p71_p6 = por %p70_p5, %p69_p4 }
   0xd   :  { %p72_p7 = pnand %p71_p6, %p65_p3 }
   0xf   :  { %75 = shalt.err (!%p72_p7)
}
  0x10   :  { %17 = dma.hbm_to_vmem [thread:$0]  %s138_s0, 256, %s15_s7, [#allocation3]  }
  0x11   :  { %98 = dma.done.wait [#allocation3], 256  }
  0x12   :  { %99 = vsyncadd [#allocation3], 4294967040  ;;  %v21_v0 = vld [vmem:[#allocation2] sm:$0xff]  ;;  %v22_v1 = vld [vmem:[#allocation2 + $0x8] sm:$0xff]  ;;  %s103_s18 = smov [#allocation5]  }
  0x13   :  { %v50_v2 = vadd.f32 1.0, %v21_v0  ;;  %v51_v3 = vadd.f32 1.0, %v22_v1  ;;  %s41_s19 = sshll.u32 %s103_s18, 4  ;;  %s42_s19 = int_to_ptr.vmem [resolvable:$true] %s41_s19 }
  0x14   :  { %s76_s0 = scalar_lea.vmem %s42_s19, 256  ;;  %p81_p9 = scmp.lt.s32.totalorder %s42_s19, %s42_s19 }
  0x15   :  { %v25_v4 = vmul.f32 127.5, %v50_v2  ;;  %v26_v5 = vmul.f32 127.5, %v51_v3  ;;  %p77_p8 = scmp.ne.s32.totalorder %s42_s19, %s76_s0  ;;  %p82_p10 = scmp.lt.s32.totalorder %s76_s0, %s76_s0 }
  0x17   :  { %v27_v6 = vadd.f32 0.5, %v25_v4  ;;  %v28_v7 = vadd.f32 0.5, %v26_v5  ;;  %p83_p11 = por %p82_p10, %p81_p9 }
  0x19   :  { %v29_v8 = vmax.f32 %v27_v6, 0.0  ;;  %v30_v9 = vmax.f32 %v28_v7, 0.0  ;;  %p84_p12 = pnand %p83_p11, %p77_p8 }
  0x1b   :  { %v31_v10 = vmin.f32 %v29_v8, 255.0  ;;  %v32_v11 = vmin.f32 %v30_v9, 255.0 }
  0x1d   :  { %33 = vst [vmem:[#allocation5] sm:$0xff] %v31_v10  ;;  %34 = vst [vmem:[#allocation5 + $0x8] sm:$0xff] %v32_v11 }
  0x1e   :  { %87 = shalt.err (!%p84_p12)
}
  0x1f   :  { %s88_s22 = scalar_lea.hbm %s139_s1, 256 }
  0x20   :  { %p89_p13 = scmp.ne.s32.totalorder %s139_s1, %s88_s22  ;;  %p92_p0 = scmp.lt.u32.totalorder %s88_s22, %s139_s1 }
  0x22   :  { %p94_p1 = pnand %p92_p0, %p89_p13 }
  0x24   :  { %97 = shalt.err (!%p94_p1)
}
  0x25   :  { %44 = dma.vmem_to_hbm [thread:$0]  %s42_s19, 256, %s139_s1, [#allocation4]  }
  0x26   :  { %100 = dma.done.wait [#allocation4], 256  }
  0x27   :  { %101 = vsyncadd [#allocation4], 4294967040 }
  0x28   :  { %48 = vsyncpa [#allocation3], 1 }
  0x29   :  { %49 = vsyncpa [#allocation4], 1 }

</bundles_post_ra>
